<compile_context>
chip_gen: v7x
topology: tpu7x:2x2x1
jax: 0.10.0
libtpu: 0.0.40
codegen_flags: <defaults>
</compile_context>

<pallas_src>
import functools

import jax
import jax.numpy as jnp
from jax.experimental import pallas as pl
from jax.experimental.pallas import tpu as pltpu

_LANE = 128


def _round_up(v: int, m: int) -> int:
    return ((v + m - 1) // m) * m


def _cdiv(a: int, b: int) -> int:
    return (a + b - 1) // b


def _make_bn1d_kernel(eps: float, momentum: float, n: int):
    inv_n = 1.0 / n
    # NB: PyTorch errors (unbiased var -> inf) for N==1 in training; we just use 1.
    unbias = n / max(n - 1, 1)
    one_minus_m = 1.0 - momentum

    def bn1d_kernel(x_ref, p_ref, y_ref, s_ref):
        # x_ref: (N, TILE_C) native dtype   p_ref: (4, TILE_C) f32 [w, b, rm, rv]
        # y_ref: (N, TILE_C) native dtype   s_ref: (2, TILE_C) f32 [new_rm, new_rv]
        x = x_ref[...].astype(jnp.float32)                            # in-kernel cast
        mean = jnp.sum(x, axis=0, keepdims=True) * inv_n              # (1, TILE_C)
        diff = x - mean
        var = jnp.sum(diff * diff, axis=0, keepdims=True) * inv_n     # biased var
        scale = jax.lax.rsqrt(var + eps) * p_ref[0:1, :]              # EUP rsqrt * weight
        y_ref[...] = (diff * scale + p_ref[1:2, :]).astype(y_ref.dtype)
        # running-stat momentum update (PyTorch uses the unbiased batch variance)
        s_ref[0:1, :] = one_minus_m * p_ref[2:3, :] + momentum * mean
        s_ref[1:2, :] = one_minus_m * p_ref[3:4, :] + momentum * (var * unbias)

    return bn1d_kernel


def _plan_tiling(n: int, c: int, x_bytes: int):
    """Choose the channel tile, grid size and scoped-VMEM limit."""
    # Conservative per-lane-column working-set bytes for one channel tile:
    # double-buffered x-in + y-out (native dtype) + ~3 f32 temps (x32/diff/prod).
    per_lane = n * (4 * x_bytes + 3 * 4)
    budget = 40 << 20  # per-block working-set budget; leaves slack under v7x's 64 MiB VMEM
    if c <= _LANE:
        tile_c = c     # full last dim is always a legal block extent
    else:
        max_lanes = max(_LANE, (budget // per_lane) // _LANE * _LANE)
        half = _round_up(_cdiv(c, 2), _LANE)   # guarantee >= 2 grid steps (v7x megacore)
        tile_c = min(max_lanes, half)
    grid = _cdiv(c, tile_c)
    # Explicit scoped-VMEM sizing (defaults: 16 MiB v5e / 32 MiB v6e,v7x would cap tiles).
    vmem = per_lane * max(tile_c, _LANE) + (6 << 20)
    # TODO(synk): very tall N (a single 128-lane column over ~42 MiB) needs a
    # batch-tiled two-pass variant; here we just clamp to stay under v7x's VMEM.
    vmem = int(min(max(vmem, 16 << 20), 48 << 20))
    return tile_c, grid, vmem


@functools.partial(jax.jit, static_argnames=("eps", "momentum"))
def meta_batch_norm1d(x, weight, bias, running_mean, running_var,
                      *, eps=1e-5, momentum=0.1):
    """x: (N, C); weight/bias/running_*: (C,).
    Returns (y, new_running_mean, new_running_var) — training-mode BatchNorm1d.
    y keeps the input dtype; the running stats are float32."""
    n, c = x.shape
    x_bytes = jnp.dtype(x.dtype).itemsize
    tile_c, grid, vmem_bytes = _plan_tiling(n, c, x_bytes)

    # Fuse the four tiny per-channel rows into one (4, C) f32 array (one DMA/step).
    params = jnp.stack(
        [weight.astype(jnp.float32),
         bias.astype(jnp.float32),
         running_mean.astype(jnp.float32),
         running_var.astype(jnp.float32)],
        axis=0)

    kernel = _make_bn1d_kernel(float(eps), float(momentum), n)

    x_spec = pl.BlockSpec((n, tile_c), lambda i: (0, i))
    p_spec = pl.BlockSpec((4, tile_c), lambda i: (0, i))
    y_spec = pl.BlockSpec((n, tile_c), lambda i: (0, i))
    s_spec = pl.BlockSpec((2, tile_c), lambda i: (0, i))

    cost = pl.CostEstimate(
        flops=7 * n * c,
        transcendentals=c,
        bytes_accessed=2 * n * c * x_bytes + 6 * c * 4,
    )

    y, stats = pl.pallas_call(
        kernel,
        grid=(grid,),
        in_specs=[x_spec, p_spec],
        out_specs=[y_spec, s_spec],
        out_shape=(
            jax.ShapeDtypeStruct((n, c), x.dtype),
            jax.ShapeDtypeStruct((2, c), jnp.float32),
        ),
        compiler_params=pltpu.CompilerParams(
            dimension_semantics=("parallel",),   # channels independent -> megacore-shardable
            vmem_limit_bytes=vmem_bytes,
        ),
        cost_estimate=cost,
    )(x, params)

    return y, stats[0], stats[1]


def _reference(x, w, b, rm, rv, eps, momentum):
    """Pure-JAX reference of F.batch_norm (training) + running-stat update."""
    n = x.shape[0]
    xf = x.astype(jnp.float32)
    mean = jnp.mean(xf, axis=0)
    var = jnp.mean((xf - mean) ** 2, axis=0)           # biased
    y = ((xf - mean) / jnp.sqrt(var + eps) * w + b).astype(x.dtype)
    rm_new = (1.0 - momentum) * rm + momentum * mean
    rv_new = (1.0 - momentum) * rv + momentum * var * (n / max(n - 1, 1))
    return y, rm_new, rv_new


if __name__ == "__main__":
    def run_case(key, n, c, dtype, atol, rtol):
        kx, kw, kb, km, kv = jax.random.split(key, 5)
        x = (jax.random.normal(kx, (n, c), dtype=jnp.float32) * 2.0 + 0.5).astype(dtype)
        w = jax.random.normal(kw, (c,), dtype=jnp.float32) * 0.1 + 1.0
        b = jax.random.normal(kb, (c,), dtype=jnp.float32) * 0.1
        rm = jax.random.normal(km, (c,), dtype=jnp.float32) * 0.1
        rv = jax.random.uniform(kv, (c,), dtype=jnp.float32) + 0.5

        y, new_rm, new_rv = meta_batch_norm1d(x, w, b, rm, rv, eps=1e-5, momentum=0.1)
        jax.block_until_ready((y, new_rm, new_rv))

        y_ref, rm_ref, rv_ref = _reference(x, w, b, rm, rv, 1e-5, 0.1)
        assert y.dtype == x.dtype, (y.dtype, x.dtype)
        assert jnp.allclose(y.astype(jnp.float32), y_ref.astype(jnp.float32),
                            atol=atol, rtol=rtol), f"y mismatch for {(n, c, dtype)}"
        assert jnp.allclose(new_rm, rm_ref, atol=1e-5, rtol=1e-5), "running_mean mismatch"
        assert jnp.allclose(new_rv, rv_ref, atol=1e-5, rtol=1e-5), "running_var mismatch"

    key = jax.random.PRNGKey(0)
    k1, k2, k3 = jax.random.split(key, 3)

    # 1) small canonical BatchNorm1d shape: single full-C tile (C < 128).
    run_case(k1, 8, 32, jnp.float32, 1e-5, 1e-5)
    # 2) ragged channel count: grid of 2 tiles, masked writeback on the last tile.
    run_case(k2, 8, 200, jnp.float32, 1e-5, 1e-5)
    # 3) bf16 activations streamed in native dtype (in-kernel f32 accumulation).
    run_case(k3, 16, 256, jnp.bfloat16, 7e-2, 7e-2)

    print("KERNEL_OK")
</pallas_src>

<mosaic_0001>
module attributes {stable_mosaic.version = 11 : i64} {
  func.func @bn1d_kernel(%arg0: i32, %arg1: memref<8x32xf32, #tpu.memory_space<vmem>>, %arg2: memref<4x32xf32, #tpu.memory_space<vmem>>, %arg3: memref<8x32xf32, #tpu.memory_space<vmem>>, %arg4: memref<2x32xf32, #tpu.memory_space<vmem>>) attributes {dimension_semantics = [#tpu.dimension_semantics<parallel>], iteration_bounds = array<i64: 1>, scalar_prefetch = 0 : i64, scratch_operands = 0 : i64, tpu.core_type = #tpu.core_type<tc>, window_params = [{transform_indices = @transform_0, window_bounds = array<i64: 8, 32>}, {transform_indices = @transform_1, window_bounds = array<i64: 4, 32>}, {transform_indices = @transform_2, window_bounds = array<i64: 8, 32>}, {transform_indices = @transform_3, window_bounds = array<i64: 2, 32>}]} {
    %c0 = arith.constant 0 : index
    %c0_0 = arith.constant 0 : index
    %0 = vector.load %arg1[%c0, %c0_0] : memref<8x32xf32, #tpu.memory_space<vmem>>, vector<8x32xf32>
    %cst = arith.constant dense<0.000000e+00> : vector<32xf32>
    %1 = vector.multi_reduction <add>, %0, %cst [0] : vector<8x32xf32> to vector<32xf32>
    %2 = vector.shape_cast %1 : vector<32xf32> to vector<1x32xf32>
    %cst_1 = arith.constant 1.250000e-01 : f32
    %3 = vector.broadcast %cst_1 : f32 to vector<1x32xf32>
    %4 = arith.mulf %2, %3 : vector<1x32xf32>
    %5 = vector.broadcast %4 : vector<1x32xf32> to vector<8x32xf32>
    %6 = arith.subf %0, %5 : vector<8x32xf32>
    %7 = arith.mulf %6, %6 : vector<8x32xf32>
    %cst_2 = arith.constant dense<0.000000e+00> : vector<32xf32>
    %8 = vector.multi_reduction <add>, %7, %cst_2 [0] : vector<8x32xf32> to vector<32xf32>
    %9 = vector.shape_cast %8 : vector<32xf32> to vector<1x32xf32>
    %cst_3 = arith.constant 1.250000e-01 : f32
    %10 = vector.broadcast %cst_3 : f32 to vector<1x32xf32>
    %11 = arith.mulf %9, %10 : vector<1x32xf32>
    %cst_4 = arith.constant 9.99999974E-6 : f32
    %12 = vector.broadcast %cst_4 : f32 to vector<1x32xf32>
    %13 = arith.addf %11, %12 : vector<1x32xf32>
    %14 = math.rsqrt %13 : vector<1x32xf32>
    %c0_5 = arith.constant 0 : index
    %c0_6 = arith.constant 0 : index
    %15 = vector.load %arg2[%c0_5, %c0_6] : memref<4x32xf32, #tpu.memory_space<vmem>>, vector<1x32xf32>
    %16 = arith.mulf %14, %15 : vector<1x32xf32>
    %17 = vector.broadcast %16 : vector<1x32xf32> to vector<8x32xf32>
    %18 = arith.mulf %6, %17 : vector<8x32xf32>
    %c1 = arith.constant 1 : index
    %c0_7 = arith.constant 0 : index
    %19 = vector.load %arg2[%c1, %c0_7] : memref<4x32xf32, #tpu.memory_space<vmem>>, vector<1x32xf32>
    %20 = vector.broadcast %19 : vector<1x32xf32> to vector<8x32xf32>
    %21 = arith.addf %18, %20 : vector<8x32xf32>
    %c0_8 = arith.constant 0 : index
    %c0_9 = arith.constant 0 : index
    %22 = vector.load %arg3[%c0_8, %c0_9] : memref<8x32xf32, #tpu.memory_space<vmem>>, vector<8x32xf32>
    tpu.vector_store %arg3[%c0_8, %c0_9], %21 {strides = array<i32>} : memref<8x32xf32, #tpu.memory_space<vmem>>, vector<8x32xf32>,
    %c2 = arith.constant 2 : index
    %c0_10 = arith.constant 0 : index
    %23 = vector.load %arg2[%c2, %c0_10] : memref<4x32xf32, #tpu.memory_space<vmem>>, vector<1x32xf32>
    %cst_11 = arith.constant 0.899999976 : f32
    %24 = vector.broadcast %cst_11 : f32 to vector<1x32xf32>
    %25 = arith.mulf %24, %23 : vector<1x32xf32>
    %cst_12 = arith.constant 1.000000e-01 : f32
    %26 = vector.broadcast %cst_12 : f32 to vector<1x32xf32>
    %27 = arith.mulf %26, %4 : vector<1x32xf32>
    %28 = arith.addf %25, %27 : vector<1x32xf32>
    %c0_13 = arith.constant 0 : index
    %c0_14 = arith.constant 0 : index
    %29 = vector.load %arg4[%c0_13, %c0_14] : memref<2x32xf32, #tpu.memory_space<vmem>>, vector<1x32xf32>
    tpu.vector_store %arg4[%c0_13, %c0_14], %28 {strides = array<i32>} : memref<2x32xf32, #tpu.memory_space<vmem>>, vector<1x32xf32>,
    %c3 = arith.constant 3 : index
    %c0_15 = arith.constant 0 : index
    %30 = vector.load %arg2[%c3, %c0_15] : memref<4x32xf32, #tpu.memory_space<vmem>>, vector<1x32xf32>
    %cst_16 = arith.constant 0.899999976 : f32
    %31 = vector.broadcast %cst_16 : f32 to vector<1x32xf32>
    %32 = arith.mulf %31, %30 : vector<1x32xf32>
    %cst_17 = arith.constant 1.14285719 : f32
    %33 = vector.broadcast %cst_17 : f32 to vector<1x32xf32>
    %34 = arith.mulf %11, %33 : vector<1x32xf32>
    %cst_18 = arith.constant 1.000000e-01 : f32
    %35 = vector.broadcast %cst_18 : f32 to vector<1x32xf32>
    %36 = arith.mulf %35, %34 : vector<1x32xf32>
    %37 = arith.addf %32, %36 : vector<1x32xf32>
    %c1_19 = arith.constant 1 : index
    %c0_20 = arith.constant 0 : index
    %38 = vector.load %arg4[%c1_19, %c0_20] : memref<2x32xf32, #tpu.memory_space<vmem>>, vector<1x32xf32>
    tpu.vector_store %arg4[%c1_19, %c0_20], %37 {strides = array<i32>} : memref<2x32xf32, #tpu.memory_space<vmem>>, vector<1x32xf32>,
    return
  }
  func.func @transform_0(%arg0: i32) -> (i32, i32) {
    %c0_i32 = arith.constant 0 : i32
    %c0_i32_0 = arith.constant 0 : i32
    return %c0_i32, %arg0 : i32, i32
  }
  func.func @transform_1(%arg0: i32) -> (i32, i32) {
    %c0_i32 = arith.constant 0 : i32
    %c0_i32_0 = arith.constant 0 : i32
    return %c0_i32, %arg0 : i32, i32
  }
  func.func @transform_2(%arg0: i32) -> (i32, i32) {
    %c0_i32 = arith.constant 0 : i32
    %c0_i32_0 = arith.constant 0 : i32
    return %c0_i32, %arg0 : i32, i32
  }
  func.func @transform_3(%arg0: i32) -> (i32, i32) {
    %c0_i32 = arith.constant 0 : i32
    %c0_i32_0 = arith.constant 0 : i32
    return %c0_i32, %arg0 : i32, i32
  }
}

</mosaic_0001>

<bundles_post_ra>
// kernel: meta_batch_norm1d.1
= control target key start
LH: loop header
LB: loop body
LE: loop exit
PB: predicated region body
PF: predicated region fallthrough
CT: control target
= control target key end

     0   :  { %vm15_vm0 = vcmask 261120   ;;  %s167_s0 = inlined_call_operand.vmem [shape: f32[8,32], index: 0, kind: input, shape index: {}]   ;;  %s168_s1 = inlined_call_operand.vmem [shape: f32[4,32], index: 1, kind: input, shape index: {}]   ;;  %s169_s2 = inlined_call_operand.hbm [shape: f32[8,32], index: 2, kind: output, shape index: {0}]   ;;  %s170_s3 = inlined_call_operand.vmem [shape: f32[2,32], index: 3, kind: output, shape index: {1}]  }
   0x1   :  { %v14_v0 = vld [vmem:[%s167_s0] sm:$0xff] }
   0x2   :  { %v16_v1 = vsel %vm15_vm0, %v14_v0, 0.0 }
   0x3   :  { %v17_v2 = vrot.slane %v16_v1, 4 }
   0x4   :  { %9 = vsyncpa [#allocation3], 0  ;;  %v50_v7 = vld [vmem:[%s168_s1 + $0x2] sm:$0x1]  ;;  %vm54_vm1 = vcmask 253952   ;;  %v38_v28 = vlaneseq  ;;  %s108_s25 = smov [#allocation2]  }
   0x5   :  { %v18_v3 = vadd.f32 %v17_v2, %v16_v1  ;;  %v51_v10 = vmul.f32 0.9, %v50_v7  ;;  %v56_v22 = vld [vmem:[%s168_s1 + $0x3] sm:$0x1]  ;;  %v36_v31 = vld [vmem:[%s168_s1] sm:$0x1] }
   0x6   :  { %v57_v25 = vmul.f32 0.9, %v56_v22  ;;  %v39_v30 = vshrl.u32 %v38_v28, 7  ;;  %v80_v36 = vld [vmem:[%s168_s1 + $0x1] ss:$0 sm:$0xff]  ;;  %s68_s26 = sshll.u32 %s108_s25, 4  ;;  %s69_s26 = int_to_ptr.vmem [resolvable:$true] %s68_s26 }
   0x7   :  { %v19_v4 = vrot.slane %v18_v3, 2  ;;  %p89_p1 = scmp.lt.s32.totalorder %s69_s26, %s69_s26 }
   0x8   :  { %v40_v32 = vsub.s32 0, %v39_v30 }
   0x9   :  { %v20_v5 = vadd.f32 %v19_v4, %v18_v3 }
   0xb   :  { %v21_v6 = vrot.slane %v20_v5, 1 }
   0xd   :  { %v22_v8 = vadd.f32 %v21_v6, %v20_v5 }
   0xf   :  { %v23_v9 = vmul.f32 0.125, %v22_v8 }
  0x11   :  { %v24_v11 = vsub.f32 %v14_v0, %v23_v9  ;;  %v52_v12 = vmul.f32 0.1, %v23_v9 }
  0x13   :  { %v25_v13 = vmul.f32 %v24_v11, %v24_v11  ;;  %v53_v14 = vadd.f32 %v52_v12, %v51_v10 }
  0x15   :  { %v26_v15 = vsel %vm15_vm0, %v25_v13, 0.0  ;;  %55 = vst.msk [vmem:[%s170_s3] sm:$0x1] %vm54_vm1, %v53_v14 }
  0x16   :  { %v27_v16 = vrot.slane %v26_v15, 4 }
  0x18   :  { %v28_v17 = vadd.f32 %v27_v16, %v26_v15 }
  0x1a   :  { %v29_v18 = vrot.slane %v28_v17, 2 }
  0x1c   :  { %v30_v19 = vadd.f32 %v29_v18, %v28_v17 }
  0x1e   :  { %v31_v20 = vrot.slane %v30_v19, 1 }
  0x20   :  { %v32_v21 = vadd.f32 %v31_v20, %v30_v19 }
  0x22   :  { %v33_v23 = vmul.f32 0.125, %v32_v21 }
  0x24   :  { %v34_v24 = vadd.f32 1e-05, %v33_v23  ;;  %v58_v26 = vmul.f32 1.1428572, %v33_v23 }
  0x26   :  { %82 = vrsqrt.f32 %v34_v24  ;;  %v59_v27 = vmul.f32 0.1, %v58_v26 }
  0x28   :  { %v60_v29 = vadd.f32 %v59_v27, %v57_v25 }
  0x2a   :  { %61 = vst.msk [vmem:[%s170_s3 + $0x1] sm:$0x1] %vm54_vm1, %v60_v29  ;;  %s84_s3 = scalar_lea.vmem %s69_s26, 128 }
  0x2b   :  { %p85_p0 = scmp.ne.s32.totalorder %s69_s26, %s84_s3  ;;  %p90_p2 = scmp.lt.s32.totalorder %s84_s3, %s84_s3 }
  0x2d   :  { %p91_p3 = por %p90_p2, %p89_p1 }
  0x2f   :  { %p92_p4 = pnand %p91_p3, %p85_p0 }
  0x30   :  { %v83_v33 = vpop.eup %82 }
  0x31   :  { %v37_v34 = vmul.f32 %v83_v33, %v36_v31 }
  0x33   :  { %v41_v35 = vrot.slane %v37_v34, %v40_v32 }
  0x35   :  { %v42_v37 = vmul.f32 %v41_v35, %v24_v11 }
  0x37   :  { %v48_v38 = vadd.f32 %v80_v36, %v42_v37 }
  0x39   :  { %49 = vst.msk [vmem:[#allocation2] sm:$0xff] %vm15_vm0, %v48_v38 }
  0x3a   :  { %95 = shalt.err (!%p92_p4)
}
  0x3b   :  { %s96_s29 = scalar_lea.hbm %s169_s2, 128 }
  0x3c   :  { %p97_p5 = scmp.ne.s32.totalorder %s169_s2, %s96_s29  ;;  %p100_p6 = scmp.lt.u32.totalorder %s96_s29, %s169_s2 }
  0x3e   :  { %p102_p7 = pnand %p100_p6, %p97_p5 }
  0x40   :  { %105 = shalt.err (!%p102_p7)
}
  0x41   :  { %71 = dma.vmem_to_hbm [thread:$0]  %s69_s26, 128, %s169_s2, [#allocation3]  }
  0x42   :  { %106 = dma.done.wait [#allocation3], 128  }
  0x43   :  { %107 = vsyncadd [#allocation3], 4294967168 }
  0x44   :  { %79 = vsyncpa [#allocation3], 1 }

</bundles_post_ra>
